<compile_context>
chip_gen: v6e
topology: v6e:2x2x1
jax: 0.10.0
libtpu: 0.0.40
codegen_flags: <defaults>
</compile_context>

<pallas_src>
import functools
import math

import jax
import jax.numpy as jnp
from jax.experimental import pallas as pl
from jax.experimental.pallas import tpu as pltpu


_TILE_CAP_MN = 512            # safe across v5e/v6e/v7x (85%+ of HBM roofline)
_TILE_CAP_K = 512
_RHS_RESIDENT_BUDGET = 16 * 1024 * 1024   # bytes, double-buffered resident RHS


def _round_up(x, m):
    return ((x + m - 1) // m) * m


def _tile_and_pad(dim, cap):
    """Pick the tile first (power of two in [128, cap]), then pad dim to it."""
    t = min(cap, max(128, pl.next_power_of_2(int(dim))))
    return t, _round_up(int(dim), t)


def _largest_tile_dividing(dim, cap=1024):
    t = 128
    while t * 2 <= cap and dim % (t * 2) == 0:
        t *= 2
    return t


# --------------------------------------------------------------------------- #
# Tiled matmul (+ bias + optional ReLU) kernels                                #
# --------------------------------------------------------------------------- #
def _mm_kernel_single(*refs, apply_relu, add_bias):
    """Single K-step: no accumulator scratch, write result directly."""
    if add_bias:
        a_ref, b_ref, bias_ref, o_ref = refs
    else:
        a_ref, b_ref, o_ref = refs
        bias_ref = None

    out = jnp.dot(a_ref[...], b_ref[...], preferred_element_type=jnp.float32)
    if add_bias:
        out = out + bias_ref[...].astype(jnp.float32)
    if apply_relu:
        out = jnp.maximum(out, 0.0)
    o_ref[...] = out.astype(o_ref.dtype)


def _mm_kernel_multi(*refs, apply_relu, add_bias, rhs_resident, tk):
    """Multi K-step: f32 VMEM accumulator, pl.when init/finalize epilogue."""
    if add_bias:
        a_ref, b_ref, bias_ref, o_ref, acc_ref = refs
    else:
        a_ref, b_ref, o_ref, acc_ref = refs
        bias_ref = None

    k = pl.program_id(2)

    @pl.when(k == 0)
    def _init():
        acc_ref[...] = jnp.zeros_like(acc_ref)

    if rhs_resident:
        # Whole RHS is VMEM-resident; slice the current K chunk in-kernel.
        kk = pl.multiple_of(k * tk, tk)
        b_blk = b_ref[pl.ds(kk, tk), :]
    else:
        b_blk = b_ref[...]

    acc_ref[...] += jnp.dot(a_ref[...], b_blk, preferred_element_type=jnp.float32)

    @pl.when(k == pl.num_programs(2) - 1)
    def _finalize():
        out = acc_ref[...]
        if add_bias:
            out = out + bias_ref[...].astype(jnp.float32)
        if apply_relu:
            out = jnp.maximum(out, 0.0)
        o_ref[...] = out.astype(o_ref.dtype)


def matmul_padded(a, b, bias=None, *, tm, tn, tk, apply_relu=False, out_dtype=None):
    """out = a @ b (+ bias) (+ ReLU). All dims must already be tile multiples."""
    M, K = a.shape
    K2, N = b.shape
    assert K == K2, (K, K2)
    assert M % tm == 0 and N % tn == 0 and K % tk == 0, (M, N, K, tm, tn, tk)

    out_dtype = out_dtype or a.dtype
    add_bias = bias is not None
    n_m, n_n, n_k = M // tm, N // tn, K // tk
    multi_k = n_k > 1

    a_bytes = jnp.dtype(a.dtype).itemsize
    b_bytes = jnp.dtype(b.dtype).itemsize
    o_bytes = jnp.dtype(out_dtype).itemsize

    # Resident RHS only pays off when there is a single N tile (true residency)
    # and the double-buffered RHS fits the budget (kept well under v7x VMEM).
    rhs_resident = (multi_k and n_n == 1
                    and 2 * K * tn * b_bytes <= _RHS_RESIDENT_BUDGET)

    inputs = [a, b]
    if multi_k:
        in_specs = [pl.BlockSpec((tm, tk), lambda i, j, k: (i, k))]
        if rhs_resident:
            in_specs.append(pl.BlockSpec((K, tn), lambda i, j, k: (0, j)))
        else:
            in_specs.append(pl.BlockSpec((tk, tn), lambda i, j, k: (k, j)))
        if add_bias:
            inputs.append(bias)
            in_specs.append(pl.BlockSpec((1, tn), lambda i, j, k: (0, j)))
        out_specs = pl.BlockSpec((tm, tn), lambda i, j, k: (i, j))
        grid = (n_m, n_n, n_k)
        scratch = [pltpu.VMEM((tm, tn), jnp.float32)]
        dims = ("parallel", "parallel", "arbitrary")
        kernel = functools.partial(_mm_kernel_multi, apply_relu=apply_relu,
                                   add_bias=add_bias,
                                   rhs_resident=rhs_resident, tk=tk)
    else:
        in_specs = [pl.BlockSpec((tm, K), lambda i, j: (i, 0)),
                    pl.BlockSpec((K, tn), lambda i, j: (0, j))]
        if add_bias:
            inputs.append(bias)
            in_specs.append(pl.BlockSpec((1, tn), lambda i, j: (0, j)))
        out_specs = pl.BlockSpec((tm, tn), lambda i, j: (i, j))
        grid = (n_m, n_n)
        scratch = []
        dims = ("parallel", "parallel")
        kernel = functools.partial(_mm_kernel_single, apply_relu=apply_relu,
                                   add_bias=add_bias)

    # Rough live-VMEM estimate (double-buffered inputs/outputs + accumulator);
    # capped at 64 MiB so the request is safe on v7x as well.
    vmem_est = 2 * tm * tk * a_bytes + 2 * tm * tn * o_bytes
    vmem_est += (2 * K * tn * b_bytes) if rhs_resident else (2 * tk * tn * b_bytes)
    if multi_k:
        vmem_est += tm * tn * 4
    if add_bias:
        vmem_est += 2 * tn * jnp.dtype(bias.dtype).itemsize
    vmem_limit = int(min(64 * 1024 * 1024, max(32 * 1024 * 1024, 2 * vmem_est)))

    return pl.pallas_call(
        kernel,
        out_shape=jax.ShapeDtypeStruct((M, N), out_dtype),
        grid_spec=pltpu.PrefetchScalarGridSpec(
            num_scalar_prefetch=0,
            grid=grid,
            in_specs=in_specs,
            out_specs=out_specs,
            scratch_shapes=scratch,
        ),
        compiler_params=pltpu.CompilerParams(
            dimension_semantics=dims,
            vmem_limit_bytes=vmem_limit,
        ),
        cost_estimate=pl.CostEstimate(
            flops=2 * M * N * K,
            transcendentals=0,
            bytes_accessed=M * K * a_bytes + K * N * b_bytes + M * N * o_bytes,
        ),
    )(*inputs)


# --------------------------------------------------------------------------- #
# Row-wise log_softmax on the padded, lane-dense matmul output                 #
# --------------------------------------------------------------------------- #
def _log_softmax_kernel(x_ref, o_ref, *, valid_cols):
    x = x_ref[...].astype(jnp.float32)
    lane = jax.lax.broadcasted_iota(jnp.int32, x.shape, 1)
    x = jnp.where(lane < valid_cols, x, jnp.float32(-1e30))  # mask padded classes
    m = jnp.max(x, axis=-1, keepdims=True)
    s = x - m
    lse = jnp.log(jnp.sum(jnp.exp(s), axis=-1, keepdims=True))
    o_ref[...] = (s - lse).astype(o_ref.dtype)


def log_softmax_padded(x, valid_cols):
    M, C = x.shape        # already padded / 128-aligned
    tm = _largest_tile_dividing(M, cap=1024)
    kernel = functools.partial(_log_softmax_kernel, valid_cols=valid_cols)
    return pl.pallas_call(
        kernel,
        out_shape=jax.ShapeDtypeStruct((M, C), jnp.float32),
        grid_spec=pltpu.PrefetchScalarGridSpec(
            num_scalar_prefetch=0,
            grid=(M // tm,),
            in_specs=[pl.BlockSpec((tm, C), lambda i: (i, 0))],
            out_specs=pl.BlockSpec((tm, C), lambda i: (i, 0)),
        ),
        compiler_params=pltpu.CompilerParams(
            dimension_semantics=("parallel",),
            vmem_limit_bytes=32 * 1024 * 1024,
        ),
    )(x)


# --------------------------------------------------------------------------- #
# HGNN forward                                                                 #
# --------------------------------------------------------------------------- #
def hgnn_forward(x, H, weights, biases, *, h_dtype=jnp.float32):
    """HGNN.forward: stack of HGNNConv (H @ (xW + b)) with ReLU, then log_softmax.

    h_dtype=jnp.bfloat16 enables the bf16 propagation path (H and activations
    in bf16, f32 accumulation) for the HBM-bound H matmul.
    """
    N, F = x.shape
    dims = [F] + [int(W.shape[1]) for W in weights]
    nclass = dims[-1]

    # Choose tiles first, pad once, keep everything padded across layers.
    t_node, Mp = _tile_and_pad(N, _TILE_CAP_MN)
    feat = [_tile_and_pad(d, _TILE_CAP_K) for d in dims]     # (tile, padded)

    x_p = jnp.pad(x, ((0, Mp - N), (0, feat[0][1] - F)))
    H_p = jnp.pad(H, ((0, Mp - N), (0, Mp - N))).astype(h_dtype)

    act_dtype = h_dtype if h_dtype != jnp.float32 else x.dtype

    h = x_p
    nl = len(weights)
    for i, (W, b) in enumerate(zip(weights, biases)):
        t_in, Kp = feat[i]
        t_out, Np = feat[i + 1]
        W_p = jnp.pad(W, ((0, Kp - W.shape[0]), (0, Np - W.shape[1]))).astype(h.dtype)
        b_p = jnp.pad(b, (0, Np - b.shape[0])).reshape(1, Np).astype(jnp.float32)

        # x @ W + b (bias fused in the f32 epilogue).
        xw = matmul_padded(h, W_p, b_p, tm=t_node, tn=t_out, tk=t_in,
                           apply_relu=False, out_dtype=act_dtype)
        # H @ (xW + b); ReLU fused on all but the last layer.
        h = matmul_padded(H_p, xw, None, tm=t_node, tn=t_out, tk=t_node,
                          apply_relu=(i < nl - 1), out_dtype=act_dtype)
        # TODO(synk): nn.Dropout is identity at inference; training-mode dropout not implemented.

    out = log_softmax_padded(h, nclass)     # lane-dense, class lanes masked in-kernel
    return out[:N, :nclass]                 # single slice back to logical shape


if __name__ == "__main__":
    # Small shapes consistent with the module: N nodes, nfeat features,
    # nhid hidden, nclass classes, nlayer=3 conv layers.
    N_NODES, NFEAT, NHID, NCLASS, NLAYER = 96, 48, 32, 10, 3

    key = jax.random.PRNGKey(0)
    kx, kh, *wkeys = jax.random.split(key, 2 + 2 * NLAYER)

    dims = [NFEAT] + [NHID] * (NLAYER - 1) + [NCLASS]
    weights, biases = [], []
    for li in range(NLAYER):
        in_ft, out_ft = dims[li], dims[li + 1]
        stdv = 1.0 / math.sqrt(out_ft)  # matches HGNNConv.reset_parameters
        kw, kb = wkeys[2 * li], wkeys[2 * li + 1]
        weights.append(jax.random.uniform(kw, (in_ft, out_ft), jnp.float32, -stdv, stdv))
        biases.append(jax.random.uniform(kb, (out_ft,), jnp.float32, -stdv, stdv))

    x = jax.random.normal(kx, (N_NODES, NFEAT), jnp.float32)
    # Deterministic row-normalized propagation matrix standing in for the
    # hypergraph Laplacian H.
    H_raw = jax.random.uniform(kh, (N_NODES, N_NODES), jnp.float32)
    H = H_raw / jnp.sum(H_raw, axis=1, keepdims=True)

    # Pure-JAX reference (module semantics, f32).
    def ref_forward(x, H, Ws, bs):
        h = x
        for i, (W, b) in enumerate(zip(Ws, bs)):
            h = jnp.dot(h, W, precision=jax.lax.Precision.HIGHEST) + b
            h = jnp.dot(H, h, precision=jax.lax.Precision.HIGHEST)
            if i < len(Ws) - 1:
                h = jnp.maximum(h, 0.0)
        return jax.nn.log_softmax(h, axis=1)

    ref = ref_forward(x, H, weights, biases)

    # f32 run (exact module semantics).
    fwd_f32 = jax.jit(functools.partial(hgnn_forward, h_dtype=jnp.float32))
    out = jax.block_until_ready(fwd_f32(x, H, weights, biases))
    assert out.shape == (N_NODES, NCLASS), out.shape
    err_f32 = float(jnp.max(jnp.abs(out - ref)))
    assert err_f32 < 2e-3, f"f32 max abs err {err_f32}"

    # bf16 propagation-matrix run (bandwidth-optimized variant): loose check.
    fwd_bf16 = jax.jit(functools.partial(hgnn_forward, h_dtype=jnp.bfloat16))
    out_bf16 = jax.block_until_ready(fwd_bf16(x, H, weights, biases))
    err_bf16 = float(jnp.max(jnp.abs(out_bf16 - ref)))
    assert err_bf16 < 5e-2, f"bf16 max abs err {err_bf16}"

    print("KERNEL_OK")
</pallas_src>

<mosaic_0001>
module attributes {stable_mosaic.version = 11 : i64} {
  func.func @_mm_kernel_single(%arg0: i32, %arg1: i32, %arg2: memref<128x128xf32, #tpu.memory_space<vmem>>, %arg3: memref<128x128xf32, #tpu.memory_space<vmem>>, %arg4: memref<128x128xf32, #tpu.memory_space<vmem>>) attributes {dimension_semantics = [#tpu.dimension_semantics<parallel>, #tpu.dimension_semantics<parallel>], iteration_bounds = array<i64: 1, 1>, scalar_prefetch = 0 : i64, scratch_operands = 0 : i64, tpu.core_type = #tpu.core_type<tc>, window_params = [{transform_indices = @transform_0, window_bounds = array<i64: 128, 128>}, {transform_indices = @transform_1, window_bounds = array<i64: 128, 128>}, {transform_indices = @transform_2, window_bounds = array<i64: 128, 128>}]} {
    %c0 = arith.constant 0 : index
    %c0_0 = arith.constant 0 : index
    %0 = vector.load %arg2[%c0, %c0_0] : memref<128x128xf32, #tpu.memory_space<vmem>>, vector<128x128xf32>
    %c0_1 = arith.constant 0 : index
    %c0_2 = arith.constant 0 : index
    %1 = vector.load %arg3[%c0_1, %c0_2] : memref<128x128xf32, #tpu.memory_space<vmem>>, vector<128x128xf32>
    %cst = arith.constant dense<0.000000e+00> : vector<128x128xf32>
    %2 = tpu.matmul %0, %1, %cst {dimension_numbers = #tpu.dot_dimension_numbers<[1], [0], [0], [1], [0, 0, 1, 1], [], []>} : vector<128x128xf32>, vector<128x128xf32>, vector<128x128xf32> -> vector<128x128xf32>
    %cst_3 = arith.constant 0.000000e+00 : f32
    %3 = vector.broadcast %cst_3 : f32 to vector<128x128xf32>
    %4 = arith.maximumf %2, %3 : vector<128x128xf32>
    %c0_4 = arith.constant 0 : index
    %c0_5 = arith.constant 0 : index
    %5 = vector.load %arg4[%c0_4, %c0_5] : memref<128x128xf32, #tpu.memory_space<vmem>>, vector<128x128xf32>
    tpu.vector_store %arg4[%c0_4, %c0_5], %4 {strides = array<i32>} : memref<128x128xf32, #tpu.memory_space<vmem>>, vector<128x128xf32>,
    return
  }
  func.func @transform_0(%arg0: i32, %arg1: i32) -> (i32, i32) {
    %c0_i32 = arith.constant 0 : i32
    %c0_i32_0 = arith.constant 0 : i32
    return %arg0, %c0_i32 : i32, i32
  }
  func.func @transform_1(%arg0: i32, %arg1: i32) -> (i32, i32) {
    %c0_i32 = arith.constant 0 : i32
    %c0_i32_0 = arith.constant 0 : i32
    return %c0_i32, %arg1 : i32, i32
  }
  func.func @transform_2(%arg0: i32, %arg1: i32) -> (i32, i32) {
    %c0_i32 = arith.constant 0 : i32
    return %arg0, %arg1 : i32, i32
  }
}

module attributes {stable_mosaic.version = 11 : i64} {
  func.func @_mm_kernel_single(%arg0: i32, %arg1: i32, %arg2: memref<128x128xf32, #tpu.memory_space<vmem>>, %arg3: memref<128x128xf32, #tpu.memory_space<vmem>>, %arg4: memref<1x128xf32, #tpu.memory_space<vmem>>, %arg5: memref<128x128xf32, #tpu.memory_space<vmem>>) attributes {dimension_semantics = [#tpu.dimension_semantics<parallel>, #tpu.dimension_semantics<parallel>], iteration_bounds = array<i64: 1, 1>, scalar_prefetch = 0 : i64, scratch_operands = 0 : i64, tpu.core_type = #tpu.core_type<tc>, window_params = [{transform_indices = @transform_0, window_bounds = array<i64: 128, 128>}, {transform_indices = @transform_1, window_bounds = array<i64: 128, 128>}, {transform_indices = @transform_2, window_bounds = array<i64: 1, 128>}, {transform_indices = @transform_3, window_bounds = array<i64: 128, 128>}]} {
    %c0 = arith.constant 0 : index
    %c0_0 = arith.constant 0 : index
    %0 = vector.load %arg2[%c0, %c0_0] : memref<128x128xf32, #tpu.memory_space<vmem>>, vector<128x128xf32>
    %c0_1 = arith.constant 0 : index
    %c0_2 = arith.constant 0 : index
    %1 = vector.load %arg3[%c0_1, %c0_2] : memref<128x128xf32, #tpu.memory_space<vmem>>, vector<128x128xf32>
    %cst = arith.constant dense<0.000000e+00> : vector<128x128xf32>
    %2 = tpu.matmul %0, %1, %cst {dimension_numbers = #tpu.dot_dimension_numbers<[1], [0], [0], [1], [0, 0, 1, 1], [], []>} : vector<128x128xf32>, vector<128x128xf32>, vector<128x128xf32> -> vector<128x128xf32>
    %c0_3 = arith.constant 0 : index
    %c0_4 = arith.constant 0 : index
    %3 = vector.load %arg4[%c0_3, %c0_4] : memref<1x128xf32, #tpu.memory_space<vmem>>, vector<1x128xf32>
    %4 = vector.broadcast %3 : vector<1x128xf32> to vector<128x128xf32>
    %5 = arith.addf %2, %4 : vector<128x128xf32>
    %c0_5 = arith.constant 0 : index
    %c0_6 = arith.constant 0 : index
    %6 = vector.load %arg5[%c0_5, %c0_6] : memref<128x128xf32, #tpu.memory_space<vmem>>, vector<128x128xf32>
    tpu.vector_store %arg5[%c0_5, %c0_6], %5 {strides = array<i32>} : memref<128x128xf32, #tpu.memory_space<vmem>>, vector<128x128xf32>,
    return
  }
  func.func @transform_0(%arg0: i32, %arg1: i32) -> (i32, i32) {
    %c0_i32 = arith.constant 0 : i32
    %c0_i32_0 = arith.constant 0 : i32
    return %arg0, %c0_i32 : i32, i32
  }
  func.func @transform_1(%arg0: i32, %arg1: i32) -> (i32, i32) {
    %c0_i32 = arith.constant 0 : i32
    %c0_i32_0 = arith.constant 0 : i32
    return %c0_i32, %arg1 : i32, i32
  }
  func.func @transform_2(%arg0: i32, %arg1: i32) -> (i32, i32) {
    %c0_i32 = arith.constant 0 : i32
    %c0_i32_0 = arith.constant 0 : i32
    return %c0_i32, %arg1 : i32, i32
  }
  func.func @transform_3(%arg0: i32, %arg1: i32) -> (i32, i32) {
    %c0_i32 = arith.constant 0 : i32
    return %arg0, %arg1 : i32, i32
  }
}

module attributes {stable_mosaic.version = 11 : i64} {
  func.func @_log_softmax_kernel(%arg0: i32, %arg1: memref<128x128xf32, #tpu.memory_space<vmem>>, %arg2: memref<128x128xf32, #tpu.memory_space<vmem>>) attributes {dimension_semantics = [#tpu.dimension_semantics<parallel>], iteration_bounds = array<i64: 1>, scalar_prefetch = 0 : i64, scratch_operands = 0 : i64, tpu.core_type = #tpu.core_type<tc>, window_params = [{transform_indices = @transform_0, window_bounds = array<i64: 128, 128>}, {transform_indices = @transform_1, window_bounds = array<i64: 128, 128>}]} {
    %c0 = arith.constant 0 : index
    %c0_0 = arith.constant 0 : index
    %0 = vector.load %arg1[%c0, %c0_0] : memref<128x128xf32, #tpu.memory_space<vmem>>, vector<128x128xf32>
    %1 = tpu.iota {dimensions = array<i32: 1>} : vector<128x128xi32>
    %c10_i32 = arith.constant 10 : i32
    %2 = vector.broadcast %c10_i32 : i32 to vector<128x128xi32>
    %3 = arith.cmpi slt, %1, %2 : vector<128x128xi32>
    %cst = arith.constant -1.000000e+30 : f32
    %4 = vector.broadcast %cst : f32 to vector<128x128xf32>
    %5 = arith.select %3, %0, %4 : vector<128x128xi1>, vector<128x128xf32>
    %cst_1 = arith.constant dense<0xFF800000> : vector<128xf32>
    %6 = vector.multi_reduction <maximumf>, %5, %cst_1 [1] : vector<128x128xf32> to vector<128xf32>
    %7 = vector.shape_cast %6 : vector<128xf32> to vector<128x1xf32>
    %8 = vector.broadcast %7 : vector<128x1xf32> to vector<128x128xf32>
    %9 = arith.subf %5, %8 : vector<128x128xf32>
    %10 = math.exp %9 : vector<128x128xf32>
    %cst_2 = arith.constant dense<0.000000e+00> : vector<128xf32>
    %11 = vector.multi_reduction <add>, %10, %cst_2 [1] : vector<128x128xf32> to vector<128xf32>
    %12 = vector.shape_cast %11 : vector<128xf32> to vector<128x1xf32>
    %13 = math.log %12 : vector<128x1xf32>
    %14 = vector.broadcast %13 : vector<128x1xf32> to vector<128x128xf32>
    %15 = arith.subf %9, %14 : vector<128x128xf32>
    %c0_3 = arith.constant 0 : index
    %c0_4 = arith.constant 0 : index
    %16 = vector.load %arg2[%c0_3, %c0_4] : memref<128x128xf32, #tpu.memory_space<vmem>>, vector<128x128xf32>
    tpu.vector_store %arg2[%c0_3, %c0_4], %15 {strides = array<i32>} : memref<128x128xf32, #tpu.memory_space<vmem>>, vector<128x128xf32>,
    return
  }
  func.func @transform_0(%arg0: i32) -> (i32, i32) {
    %c0_i32 = arith.constant 0 : i32
    %c0_i32_0 = arith.constant 0 : i32
    return %arg0, %c0_i32 : i32, i32
  }
  func.func @transform_1(%arg0: i32) -> (i32, i32) {
    %c0_i32 = arith.constant 0 : i32
    %c0_i32_0 = arith.constant 0 : i32
    return %arg0, %c0_i32 : i32, i32
  }
}

module attributes {stable_mosaic.version = 11 : i64} {
  func.func @_mm_kernel_single(%arg0: i32, %arg1: i32, %arg2: memref<128x128xf32, #tpu.memory_space<vmem>>, %arg3: memref<128x128xf32, #tpu.memory_space<vmem>>, %arg4: memref<128x128xf32, #tpu.memory_space<vmem>>) attributes {dimension_semantics = [#tpu.dimension_semantics<parallel>, #tpu.dimension_semantics<parallel>], iteration_bounds = array<i64: 1, 1>, scalar_prefetch = 0 : i64, scratch_operands = 0 : i64, tpu.core_type = #tpu.core_type<tc>, window_params = [{transform_indices = @transform_0, window_bounds = array<i64: 128, 128>}, {transform_indices = @transform_1, window_bounds = array<i64: 128, 128>}, {transform_indices = @transform_2, window_bounds = array<i64: 128, 128>}]} {
    %c0 = arith.constant 0 : index
    %c0_0 = arith.constant 0 : index
    %0 = vector.load %arg2[%c0, %c0_0] : memref<128x128xf32, #tpu.memory_space<vmem>>, vector<128x128xf32>
    %c0_1 = arith.constant 0 : index
    %c0_2 = arith.constant 0 : index
    %1 = vector.load %arg3[%c0_1, %c0_2] : memref<128x128xf32, #tpu.memory_space<vmem>>, vector<128x128xf32>
    %cst = arith.constant dense<0.000000e+00> : vector<128x128xf32>
    %2 = tpu.matmul %0, %1, %cst {dimension_numbers = #tpu.dot_dimension_numbers<[1], [0], [0], [1], [0, 0, 1, 1], [], []>} : vector<128x128xf32>, vector<128x128xf32>, vector<128x128xf32> -> vector<128x128xf32>
    %c0_3 = arith.constant 0 : index
    %c0_4 = arith.constant 0 : index
    %3 = vector.load %arg4[%c0_3, %c0_4] : memref<128x128xf32, #tpu.memory_space<vmem>>, vector<128x128xf32>
    tpu.vector_store %arg4[%c0_3, %c0_4], %2 {strides = array<i32>} : memref<128x128xf32, #tpu.memory_space<vmem>>, vector<128x128xf32>,
    return
  }
  func.func @transform_0(%arg0: i32, %arg1: i32) -> (i32, i32) {
    %c0_i32 = arith.constant 0 : i32
    %c0_i32_0 = arith.constant 0 : i32
    return %arg0, %c0_i32 : i32, i32
  }
  func.func @transform_1(%arg0: i32, %arg1: i32) -> (i32, i32) {
    %c0_i32 = arith.constant 0 : i32
    %c0_i32_0 = arith.constant 0 : i32
    return %c0_i32, %arg1 : i32, i32
  }
  func.func @transform_2(%arg0: i32, %arg1: i32) -> (i32, i32) {
    %c0_i32 = arith.constant 0 : i32
    return %arg0, %arg1 : i32, i32
  }
}

</mosaic_0001>

<bundles_post_ra>
// kernel: hgnn_forward.8
= control target key start
LH: loop header
LB: loop body
LE: loop exit
PB: predicated region body
PF: predicated region fallthrough
CT: control target
= control target key end

     0   :  { %s503_s1 = inlined_call_operand.vmem [shape: f32[128,128], index: 1, kind: input, shape index: {}]   ;;  %s504_s0 = inlined_call_operand.vmem [shape: f32[128,128], index: 0, kind: input, shape index: {}]   ;;  %s505_s2 = inlined_call_operand.vmem [shape: f32[128,128], index: 2, kind: output, shape index: {}]  }
   0x1   :  { %v42_v0 = vld [vmem:[%s503_s1 + $0x78] sm:$0xff]  ;;  %v41_v1 = vld [vmem:[%s503_s1 + $0x70] sm:$0xff]  ;;  %v40_v2 = vld [vmem:[%s503_s1 + $0x68] sm:$0xff] }
   0x2   :  { %256 = vmatprep.subr.mxu0 %v42_v0  ;;  %312 = vmatprep.subr.mxu1 %v42_v0  ;;  %v39_v3 = vld [vmem:[%s503_s1 + $0x60] sm:$0xff]  ;;  %v38_v4 = vld [vmem:[%s503_s1 + $0x58] sm:$0xff]  ;;  %v37_v5 = vld [vmem:[%s503_s1 + $0x50] sm:$0xff] }
   0x3   :  { %257 = vmatpush3.msra.mxu0 %v42_v0  ;;  %328 = vmatpush3.msra.mxu1 %v42_v0  ;;  %v36_v6 = vld [vmem:[%s503_s1 + $0x48] sm:$0xff]  ;;  %v35_v7 = vld [vmem:[%s503_s1 + $0x40] sm:$0xff]  ;;  %v34_v8 = vld [vmem:[%s503_s1 + $0x38] sm:$0xff] }
   0x4   :  { %258 = vmatprep.subr.mxu0 %v41_v1  ;;  %313 = vmatprep.subr.mxu1 %v41_v1  ;;  %v33_v9 = vld [vmem:[%s503_s1 + $0x30] sm:$0xff]  ;;  %v32_v10 = vld [vmem:[%s503_s1 + $0x28] sm:$0xff]  ;;  %v31_v11 = vld [vmem:[%s503_s1 + $0x20] sm:$0xff] }
   0x5   :  { %259 = vmatpush3.msra.mxu0 %v41_v1  ;;  %329 = vmatpush3.msra.mxu1 %v41_v1  ;;  %v30_v12 = vld [vmem:[%s503_s1 + $0x18] sm:$0xff]  ;;  %v29_v13 = vld [vmem:[%s503_s1 + $0x10] sm:$0xff]  ;;  %v28_v14 = vld [vmem:[%s503_s1 + $0x8] sm:$0xff] }
   0x6   :  { %260 = vmatprep.subr.mxu0 %v40_v2  ;;  %314 = vmatprep.subr.mxu1 %v40_v2  ;;  %v27_v15 = vld [vmem:[%s503_s1] sm:$0xff]  ;;  %v12_v18 = vld [vmem:[%s504_s0 + $0x8] sm:$0xff]  ;;  %v13_v20 = vld [vmem:[%s504_s0 + $0x10] sm:$0xff] }
   0x7   :  { %261 = vmatpush3.msra.mxu0 %v40_v2  ;;  %330 = vmatpush3.msra.mxu1 %v40_v2  ;;  %v11_v16 = vld [vmem:[%s504_s0] sm:$0xff]  ;;  %v20_v19 = vld [vmem:[%s504_s0 + $0x48] sm:$0xff]  ;;  %v21_v21 = vld [vmem:[%s504_s0 + $0x50] sm:$0xff] }
   0x8   :  { %262 = vmatprep.subr.mxu0 %v39_v3  ;;  %315 = vmatprep.subr.mxu1 %v39_v3  ;;  %v19_v17 = vld [vmem:[%s504_s0 + $0x40] sm:$0xff]  ;;  %v14_v22 = vld [vmem:[%s504_s0 + $0x18] sm:$0xff]  ;;  %v16_v26 = vld [vmem:[%s504_s0 + $0x28] sm:$0xff] }
   0x9   :  { %263 = vmatpush3.msra.mxu0 %v39_v3  ;;  %331 = vmatpush3.msra.mxu1 %v39_v3  ;;  %v22_v23 = vld [vmem:[%s504_s0 + $0x58] sm:$0xff]  ;;  %v15_v24 = vld [vmem:[%s504_s0 + $0x20] sm:$0xff]  ;;  %v24_v27 = vld [vmem:[%s504_s0 + $0x68] sm:$0xff] }
   0xa   :  { %264 = vmatprep.subr.mxu0 %v38_v4  ;;  %316 = vmatprep.subr.mxu1 %v38_v4  ;;  %v23_v25 = vld [vmem:[%s504_s0 + $0x60] sm:$0xff]  ;;  %v17_v28 = vld [vmem:[%s504_s0 + $0x30] sm:$0xff]  ;;  %v18_v30 = vld [vmem:[%s504_s0 + $0x38] sm:$0xff] }
   0xb   :  { %265 = vmatpush3.msra.mxu0 %v38_v4  ;;  %332 = vmatpush3.msra.mxu1 %v38_v4  ;;  %v25_v29 = vld [vmem:[%s504_s0 + $0x70] sm:$0xff]  ;;  %v26_v31 = vld [vmem:[%s504_s0 + $0x78] sm:$0xff] }
   0xc   :  { %266 = vmatprep.subr.mxu0 %v37_v5  ;;  %317 = vmatprep.subr.mxu1 %v37_v5 }
   0xd   :  { %267 = vmatpush3.msra.mxu0 %v37_v5  ;;  %333 = vmatpush3.msra.mxu1 %v37_v5 }
   0xe   :  { %268 = vmatprep.subr.mxu0 %v36_v6  ;;  %318 = vmatprep.subr.mxu1 %v36_v6 }
   0xf   :  { %269 = vmatpush3.msra.mxu0 %v36_v6  ;;  %334 = vmatpush3.msra.mxu1 %v36_v6 }
  0x10   :  { %270 = vmatprep.subr.mxu0 %v35_v7  ;;  %319 = vmatprep.subr.mxu1 %v35_v7 }
  0x11   :  { %271 = vmatpush3.msra.mxu0 %v35_v7  ;;  %335 = vmatpush3.msra.mxu1 %v35_v7 }
  0x12   :  { %272 = vmatprep.subr.mxu0 %v34_v8  ;;  %320 = vmatprep.subr.mxu1 %v34_v8 }
  0x13   :  { %273 = vmatpush3.msra.mxu0 %v34_v8  ;;  %336 = vmatpush3.msra.mxu1 %v34_v8 }
  0x14   :  { %274 = vmatprep.subr.mxu0 %v33_v9  ;;  %321 = vmatprep.subr.mxu1 %v33_v9 }
  0x15   :  { %275 = vmatpush3.msra.mxu0 %v33_v9  ;;  %337 = vmatpush3.msra.mxu1 %v33_v9 }
  0x16   :  { %276 = vmatprep.subr.mxu0 %v32_v10  ;;  %322 = vmatprep.subr.mxu1 %v32_v10 }
  0x17   :  { %277 = vmatpush3.msra.mxu0 %v32_v10  ;;  %338 = vmatpush3.msra.mxu1 %v32_v10 }
  0x18   :  { %278 = vmatprep.subr.mxu0 %v31_v11  ;;  %323 = vmatprep.subr.mxu1 %v31_v11 }
  0x19   :  { %279 = vmatpush3.msra.mxu0 %v31_v11  ;;  %339 = vmatpush3.msra.mxu1 %v31_v11 }
  0x1a   :  { %280 = vmatprep.subr.mxu0 %v30_v12  ;;  %324 = vmatprep.subr.mxu1 %v30_v12 }
  0x1b   :  { %281 = vmatpush3.msra.mxu0 %v30_v12  ;;  %340 = vmatpush3.msra.mxu1 %v30_v12 }
  0x1c   :  { %282 = vmatprep.subr.mxu0 %v29_v13  ;;  %325 = vmatprep.subr.mxu1 %v29_v13 }
  0x1d   :  { %283 = vmatpush3.msra.mxu0 %v29_v13  ;;  %341 = vmatpush3.msra.mxu1 %v29_v13 }
  0x1e   :  { %284 = vmatprep.subr.mxu0 %v28_v14  ;;  %326 = vmatprep.subr.mxu1 %v28_v14 }
  0x1f   :  { %285 = vmatpush3.msra.mxu0 %v28_v14  ;;  %342 = vmatpush3.msra.mxu1 %v28_v14 }
  0x20   :  { %286 = vmatprep.subr.mxu0 %v27_v15  ;;  %327 = vmatprep.subr.mxu1 %v27_v15 }
  0x21   :  { %287 = vmatpush3.msra.mxu0 %v27_v15  ;;  %343 = vmatpush3.msra.mxu1 %v27_v15 }
  0x22   :  { %288 = vmatprep.mubr.f32.mxu0 %v11_v16  ;;  %300 = vmatprep.mubr.f32.mxu1 %v19_v17 }
  0x23   :  { %289 = vmatmul.mubr.f32.vlgmr.msra.gmra.mxu0 %v12_v18  ;;  %301 = vmatmul.mubr.f32.vlgmr.msra.gmra.mxu1 %v20_v19 }
  0x24   :  { %291 = vmatprep.mubr.f32.mxu0 %v13_v20  ;;  %303 = vmatprep.mubr.f32.mxu1 %v21_v21 }
  0x27   :  { %292 = vmatmul.mubr.f32.gmra.mxu0 %v14_v22  ;;  %304 = vmatmul.mubr.f32.gmra.mxu1 %v22_v23 }
  0x28   :  { %294 = vmatprep.mubr.f32.mxu0 %v15_v24  ;;  %306 = vmatprep.mubr.f32.mxu1 %v23_v25 }
  0x2b   :  { %295 = vmatmul.mubr.f32.gmra.mxu0 %v16_v26  ;;  %307 = vmatmul.mubr.f32.gmra.mxu1 %v24_v27 }
  0x2c   :  { %297 = vmatprep.mubr.f32.mxu0 %v17_v28  ;;  %309 = vmatprep.mubr.f32.mxu1 %v25_v29 }
  0x2f   :  { %298 = vmatmul.mubr.f32.gmra.mxu0 %v18_v30  ;;  %310 = vmatmul.mubr.f32.gmra.mxu1 %v26_v31 }
  0xe3   :  { %v290_v32 = vpop.f32.mrf.mxu0  ;;  %v302_v33 = vpop.f32.mrf.mxu1 }
  0xe4   :  { %v189_v34 = vmax.f32 %v290_v32, 0.0  ;;  %v197_v35 = vmax.f32 %v302_v33, 0.0 }
  0xe5   :  { %v109_v36 = vpop.f32.mrf.mxu0  ;;  %v149_v37 = vpop.f32.mrf.mxu1 }
  0xe6   :  { %205 = vst [vmem:[%s505_s2 + $0x8] sm:$0xff] %v189_v34  ;;  %213 = vst [vmem:[%s505_s2 + $0x48] sm:$0xff] %v197_v35  ;;  %v188_v38 = vmax.f32 %v109_v36, 0.0  ;;  %v196_v39 = vmax.f32 %v149_v37, 0.0 }
  0xe7   :  { %v293_v40 = vpop.f32.mrf.mxu0  ;;  %v305_v41 = vpop.f32.mrf.mxu1 }
  0xe8   :  { %204 = vst [vmem:[%s505_s2] sm:$0xff] %v188_v38  ;;  %212 = vst [vmem:[%s505_s2 + $0x40] sm:$0xff] %v196_v39  ;;  %v191_v42 = vmax.f32 %v293_v40, 0.0  ;;  %v199_v43 = vmax.f32 %v305_v41, 0.0 }
  0xe9   :  { %v119_v44 = vpop.f32.mrf.mxu0  ;;  %v159_v45 = vpop.f32.mrf.mxu1 }
  0xea   :  { %207 = vst [vmem:[%s505_s2 + $0x18] sm:$0xff] %v191_v42  ;;  %215 = vst [vmem:[%s505_s2 + $0x58] sm:$0xff] %v199_v43  ;;  %v190_v46 = vmax.f32 %v119_v44, 0.0  ;;  %v198_v47 = vmax.f32 %v159_v45, 0.0 }
  0xeb   :  { %v296_v48 = vpop.f32.mrf.mxu0  ;;  %v308_v49 = vpop.f32.mrf.mxu1 }
  0xec   :  { %206 = vst [vmem:[%s505_s2 + $0x10] sm:$0xff] %v190_v46  ;;  %214 = vst [vmem:[%s505_s2 + $0x50] sm:$0xff] %v198_v47  ;;  %v193_v50 = vmax.f32 %v296_v48, 0.0  ;;  %v201_v51 = vmax.f32 %v308_v49, 0.0 }
  0xed   :  { %v129_v52 = vpop.f32.mrf.mxu0  ;;  %v169_v53 = vpop.f32.mrf.mxu1 }
  0xee   :  { %209 = vst [vmem:[%s505_s2 + $0x28] sm:$0xff] %v193_v50  ;;  %217 = vst [vmem:[%s505_s2 + $0x68] sm:$0xff] %v201_v51  ;;  %v192_v54 = vmax.f32 %v129_v52, 0.0  ;;  %v200_v55 = vmax.f32 %v169_v53, 0.0 }
  0xef   :  { %v299_v56 = vpop.f32.mrf.mxu0  ;;  %v311_v57 = vpop.f32.mrf.mxu1 }
  0xf0   :  { %208 = vst [vmem:[%s505_s2 + $0x20] sm:$0xff] %v192_v54  ;;  %216 = vst [vmem:[%s505_s2 + $0x60] sm:$0xff] %v200_v55  ;;  %v195_v58 = vmax.f32 %v299_v56, 0.0  ;;  %v203_v59 = vmax.f32 %v311_v57, 0.0 }
  0xf1   :  { %v139_v60 = vpop.f32.mrf.mxu0  ;;  %v179_v61 = vpop.f32.mrf.mxu1 }
  0xf2   :  { %211 = vst [vmem:[%s505_s2 + $0x38] sm:$0xff] %v195_v58  ;;  %219 = vst [vmem:[%s505_s2 + $0x78] sm:$0xff] %v203_v59  ;;  %v194_v62 = vmax.f32 %v139_v60, 0.0  ;;  %v202_v63 = vmax.f32 %v179_v61, 0.0 }
  0xf4   :  { %210 = vst [vmem:[%s505_s2 + $0x30] sm:$0xff] %v194_v62  ;;  %218 = vst [vmem:[%s505_s2 + $0x70] sm:$0xff] %v202_v63 }

// kernel: hgnn_forward.7
= control target key start
LH: loop header
LB: loop body
LE: loop exit
PB: predicated region body
PF: predicated region fallthrough
CT: control target
= control target key end

     0   :  { %s506_s1 = inlined_call_operand.vmem [shape: f32[128,128], index: 1, kind: input, shape index: {}]   ;;  %s507_s0 = inlined_call_operand.vmem [shape: f32[128,128], index: 0, kind: input, shape index: {}]   ;;  %s508_s2 = inlined_call_operand.vmem [shape: f32[1,128], index: 2, kind: input, shape index: {}]   ;;  %s509_s3 = inlined_call_operand.vmem [shape: f32[128,128], index: 3, kind: output, shape index: {}]  }
   0x1   :  { %v45_v0 = vld [vmem:[%s506_s1 + $0x78] sm:$0xff]  ;;  %v44_v1 = vld [vmem:[%s506_s1 + $0x70] sm:$0xff]  ;;  %v43_v2 = vld [vmem:[%s506_s1 + $0x68] sm:$0xff] }
   0x2   :  { %251 = vmatprep.subr.mxu0 %v45_v0  ;;  %307 = vmatprep.subr.mxu1 %v45_v0  ;;  %v42_v3 = vld [vmem:[%s506_s1 + $0x60] sm:$0xff]  ;;  %v41_v4 = vld [vmem:[%s506_s1 + $0x58] sm:$0xff]  ;;  %v40_v5 = vld [vmem:[%s506_s1 + $0x50] sm:$0xff] }
   0x3   :  { %252 = vmatpush3.msra.mxu0 %v45_v0  ;;  %323 = vmatpush3.msra.mxu1 %v45_v0  ;;  %v39_v6 = vld [vmem:[%s506_s1 + $0x48] sm:$0xff]  ;;  %v38_v7 = vld [vmem:[%s506_s1 + $0x40] sm:$0xff]  ;;  %v37_v8 = vld [vmem:[%s506_s1 + $0x38] sm:$0xff] }
   0x4   :  { %253 = vmatprep.subr.mxu0 %v44_v1  ;;  %308 = vmatprep.subr.mxu1 %v44_v1  ;;  %v36_v9 = vld [vmem:[%s506_s1 + $0x30] sm:$0xff]  ;;  %v35_v10 = vld [vmem:[%s506_s1 + $0x28] sm:$0xff]  ;;  %v34_v11 = vld [vmem:[%s506_s1 + $0x20] sm:$0xff] }
   0x5   :  { %254 = vmatpush3.msra.mxu0 %v44_v1  ;;  %324 = vmatpush3.msra.mxu1 %v44_v1  ;;  %v33_v12 = vld [vmem:[%s506_s1 + $0x18] sm:$0xff]  ;;  %v32_v13 = vld [vmem:[%s506_s1 + $0x10] sm:$0xff]  ;;  %v31_v14 = vld [vmem:[%s506_s1 + $0x8] sm:$0xff] }
   0x6   :  { %255 = vmatprep.subr.mxu0 %v43_v2  ;;  %309 = vmatprep.subr.mxu1 %v43_v2  ;;  %v30_v15 = vld [vmem:[%s506_s1] sm:$0xff]  ;;  %v15_v18 = vld [vmem:[%s507_s0 + $0x8] sm:$0xff]  ;;  %v16_v20 = vld [vmem:[%s507_s0 + $0x10] sm:$0xff] }
   0x7   :  { %256 = vmatpush3.msra.mxu0 %v43_v2  ;;  %325 = vmatpush3.msra.mxu1 %v43_v2  ;;  %v14_v16 = vld [vmem:[%s507_s0] sm:$0xff]  ;;  %v23_v19 = vld [vmem:[%s507_s0 + $0x48] sm:$0xff]  ;;  %v24_v21 = vld [vmem:[%s507_s0 + $0x50] sm:$0xff] }
   0x8   :  { %257 = vmatprep.subr.mxu0 %v42_v3  ;;  %310 = vmatprep.subr.mxu1 %v42_v3  ;;  %v22_v17 = vld [vmem:[%s507_s0 + $0x40] sm:$0xff]  ;;  %v17_v22 = vld [vmem:[%s507_s0 + $0x18] sm:$0xff]  ;;  %v19_v26 = vld [vmem:[%s507_s0 + $0x28] sm:$0xff] }
   0x9   :  { %258 = vmatpush3.msra.mxu0 %v42_v3  ;;  %326 = vmatpush3.msra.mxu1 %v42_v3  ;;  %v25_v23 = vld [vmem:[%s507_s0 + $0x58] sm:$0xff]  ;;  %v18_v24 = vld [vmem:[%s507_s0 + $0x20] sm:$0xff]  ;;  %v27_v27 = vld [vmem:[%s507_s0 + $0x68] sm:$0xff] }
   0xa   :  { %259 = vmatprep.subr.mxu0 %v41_v4  ;;  %311 = vmatprep.subr.mxu1 %v41_v4  ;;  %v26_v25 = vld [vmem:[%s507_s0 + $0x60] sm:$0xff]  ;;  %v20_v28 = vld [vmem:[%s507_s0 + $0x30] sm:$0xff]  ;;  %v21_v30 = vld [vmem:[%s507_s0 + $0x38] sm:$0xff] }
   0xb   :  { %260 = vmatpush3.msra.mxu0 %v41_v4  ;;  %327 = vmatpush3.msra.mxu1 %v41_v4  ;;  %v28_v29 = vld [vmem:[%s507_s0 + $0x70] sm:$0xff]  ;;  %v29_v31 = vld [vmem:[%s507_s0 + $0x78] sm:$0xff]  ;;  %v218_v32 = vld [vmem:[%s508_s2] ss:$0 sm:$0xff] }
   0xc   :  { %261 = vmatprep.subr.mxu0 %v40_v5  ;;  %312 = vmatprep.subr.mxu1 %v40_v5 }
   0xd   :  { %262 = vmatpush3.msra.mxu0 %v40_v5  ;;  %328 = vmatpush3.msra.mxu1 %v40_v5 }
   0xe   :  { %263 = vmatprep.subr.mxu0 %v39_v6  ;;  %313 = vmatprep.subr.mxu1 %v39_v6 }
   0xf   :  { %264 = vmatpush3.msra.mxu0 %v39_v6  ;;  %329 = vmatpush3.msra.mxu1 %v39_v6 }
  0x10   :  { %265 = vmatprep.subr.mxu0 %v38_v7  ;;  %314 = vmatprep.subr.mxu1 %v38_v7 }
  0x11   :  { %266 = vmatpush3.msra.mxu0 %v38_v7  ;;  %330 = vmatpush3.msra.mxu1 %v38_v7 }
  0x12   :  { %267 = vmatprep.subr.mxu0 %v37_v8  ;;  %315 = vmatprep.subr.mxu1 %v37_v8 }
  0x13   :  { %268 = vmatpush3.msra.mxu0 %v37_v8  ;;  %331 = vmatpush3.msra.mxu1 %v37_v8 }
  0x14   :  { %269 = vmatprep.subr.mxu0 %v36_v9  ;;  %316 = vmatprep.subr.mxu1 %v36_v9 }
  0x15   :  { %270 = vmatpush3.msra.mxu0 %v36_v9  ;;  %332 = vmatpush3.msra.mxu1 %v36_v9 }
  0x16   :  { %271 = vmatprep.subr.mxu0 %v35_v10  ;;  %317 = vmatprep.subr.mxu1 %v35_v10 }
  0x17   :  { %272 = vmatpush3.msra.mxu0 %v35_v10  ;;  %333 = vmatpush3.msra.mxu1 %v35_v10 }
  0x18   :  { %273 = vmatprep.subr.mxu0 %v34_v11  ;;  %318 = vmatprep.subr.mxu1 %v34_v11 }
  0x19   :  { %274 = vmatpush3.msra.mxu0 %v34_v11  ;;  %334 = vmatpush3.msra.mxu1 %v34_v11 }
  0x1a   :  { %275 = vmatprep.subr.mxu0 %v33_v12  ;;  %319 = vmatprep.subr.mxu1 %v33_v12 }
  0x1b   :  { %276 = vmatpush3.msra.mxu0 %v33_v12  ;;  %335 = vmatpush3.msra.mxu1 %v33_v12 }
  0x1c   :  { %277 = vmatprep.subr.mxu0 %v32_v13  ;;  %320 = vmatprep.subr.mxu1 %v32_v13 }
  0x1d   :  { %278 = vmatpush3.msra.mxu0 %v32_v13  ;;  %336 = vmatpush3.msra.mxu1 %v32_v13 }
  0x1e   :  { %279 = vmatprep.subr.mxu0 %v31_v14  ;;  %321 = vmatprep.subr.mxu1 %v31_v14 }
  0x1f   :  { %280 = vmatpush3.msra.mxu0 %v31_v14  ;;  %337 = vmatpush3.msra.mxu1 %v31_v14 }
  0x20   :  { %281 = vmatprep.subr.mxu0 %v30_v15  ;;  %322 = vmatprep.subr.mxu1 %v30_v15 }
  0x21   :  { %282 = vmatpush3.msra.mxu0 %v30_v15  ;;  %338 = vmatpush3.msra.mxu1 %v30_v15 }
  0x22   :  { %283 = vmatprep.mubr.f32.mxu0 %v14_v16  ;;  %295 = vmatprep.mubr.f32.mxu1 %v22_v17 }
  0x23   :  { %284 = vmatmul.mubr.f32.vlgmr.msra.gmra.mxu0 %v15_v18  ;;  %296 = vmatmul.mubr.f32.vlgmr.msra.gmra.mxu1 %v23_v19 }
  0x24   :  { %286 = vmatprep.mubr.f32.mxu0 %v16_v20  ;;  %298 = vmatprep.mubr.f32.mxu1 %v24_v21 }
  0x27   :  { %287 = vmatmul.mubr.f32.gmra.mxu0 %v17_v22  ;;  %299 = vmatmul.mubr.f32.gmra.mxu1 %v25_v23 }
  0x28   :  { %289 = vmatprep.mubr.f32.mxu0 %v18_v24  ;;  %301 = vmatprep.mubr.f32.mxu1 %v26_v25 }
  0x2b   :  { %290 = vmatmul.mubr.f32.gmra.mxu0 %v19_v26  ;;  %302 = vmatmul.mubr.f32.gmra.mxu1 %v27_v27 }
  0x2c   :  { %292 = vmatprep.mubr.f32.mxu0 %v20_v28  ;;  %304 = vmatprep.mubr.f32.mxu1 %v28_v29 }
  0x2f   :  { %293 = vmatmul.mubr.f32.gmra.mxu0 %v21_v30  ;;  %305 = vmatmul.mubr.f32.gmra.mxu1 %v29_v31 }
  0xe3   :  { %v285_v33 = vpop.f32.mrf.mxu0  ;;  %v297_v34 = vpop.f32.mrf.mxu1 }
  0xe4   :  { %v125_v35 = vadd.f32 %v285_v33, %v218_v32  ;;  %v165_v36 = vadd.f32 %v297_v34, %v218_v32 }
  0xe5   :  { %v119_v37 = vpop.f32.mrf.mxu0  ;;  %v159_v38 = vpop.f32.mrf.mxu1 }
  0xe6   :  { %199 = vst [vmem:[%s509_s3 + $0x8] sm:$0xff] %v125_v35  ;;  %207 = vst [vmem:[%s509_s3 + $0x48] sm:$0xff] %v165_v36  ;;  %v120_v39 = vadd.f32 %v218_v32, %v119_v37  ;;  %v160_v40 = vadd.f32 %v218_v32, %v159_v38 }
  0xe7   :  { %v288_v41 = vpop.f32.mrf.mxu0  ;;  %v300_v42 = vpop.f32.mrf.mxu1 }
  0xe8   :  { %198 = vst [vmem:[%s509_s3] sm:$0xff] %v120_v39  ;;  %206 = vst [vmem:[%s509_s3 + $0x40] sm:$0xff] %v160_v40  ;;  %v135_v43 = vadd.f32 %v288_v41, %v218_v32  ;;  %v175_v44 = vadd.f32 %v300_v42, %v218_v32 }
  0xe9   :  { %v129_v45 = vpop.f32.mrf.mxu0  ;;  %v169_v46 = vpop.f32.mrf.mxu1 }
  0xea   :  { %201 = vst [vmem:[%s509_s3 + $0x18] sm:$0xff] %v135_v43  ;;  %209 = vst [vmem:[%s509_s3 + $0x58] sm:$0xff] %v175_v44  ;;  %v130_v47 = vadd.f32 %v218_v32, %v129_v45  ;;  %v170_v48 = vadd.f32 %v218_v32, %v169_v46 }
  0xeb   :  { %v291_v49 = vpop.f32.mrf.mxu0  ;;  %v303_v50 = vpop.f32.mrf.mxu1 }
  0xec   :  { %200 = vst [vmem:[%s509_s3 + $0x10] sm:$0xff] %v130_v47  ;;  %208 = vst [vmem:[%s509_s3 + $0x50] sm:$0xff] %v170_v48  ;;  %v145_v51 = vadd.f32 %v291_v49, %v218_v32  ;;  %v185_v52 = vadd.f32 %v303_v50, %v218_v32 }
  0xed   :  { %v139_v53 = vpop.f32.mrf.mxu0  ;;  %v179_v54 = vpop.f32.mrf.mxu1 }
  0xee   :  { %203 = vst [vmem:[%s509_s3 + $0x28] sm:$0xff] %v145_v51  ;;  %211 = vst [vmem:[%s509_s3 + $0x68] sm:$0xff] %v185_v52  ;;  %v140_v55 = vadd.f32 %v218_v32, %v139_v53  ;;  %v180_v56 = vadd.f32 %v218_v32, %v179_v54 }
  0xef   :  { %v294_v57 = vpop.f32.mrf.mxu0  ;;  %v306_v58 = vpop.f32.mrf.mxu1 }
  0xf0   :  { %202 = vst [vmem:[%s509_s3 + $0x20] sm:$0xff] %v140_v55  ;;  %210 = vst [vmem:[%s509_s3 + $0x60] sm:$0xff] %v180_v56  ;;  %v155_v59 = vadd.f32 %v294_v57, %v218_v32  ;;  %v195_v60 = vadd.f32 %v306_v58, %v218_v32 }
  0xf1   :  { %v149_v61 = vpop.f32.mrf.mxu0  ;;  %v189_v62 = vpop.f32.mrf.mxu1 }
  0xf2   :  { %205 = vst [vmem:[%s509_s3 + $0x38] sm:$0xff] %v155_v59  ;;  %213 = vst [vmem:[%s509_s3 + $0x78] sm:$0xff] %v195_v60  ;;  %v150_v63 = vadd.f32 %v218_v32, %v149_v61  ;;  %v190_v0 = vadd.f32 %v218_v32, %v189_v62 }
  0xf4   :  { %204 = vst [vmem:[%s509_s3 + $0x30] sm:$0xff] %v150_v63  ;;  %212 = vst [vmem:[%s509_s3 + $0x70] sm:$0xff] %v190_v0 }

// kernel: hgnn_forward.13
= control target key start
LH: loop header
LB: loop body
LE: loop exit
PB: predicated region body
PF: predicated region fallthrough
CT: control target
= control target key end

     0   :  { %v24_v0 = vlaneseq  ;;  %s489_s0 = inlined_call_operand.vmem [shape: f32[128,128], index: 0, kind: input, shape index: {}]   ;;  %s490_s1 = inlined_call_operand.vmem [shape: f32[128,128], index: 1, kind: output, shape index: {}]  }
   0x1   :  { %v8_v1 = vld [vmem:[%s489_s0] sm:$0xff]  ;;  %v10_v3 = vld [vmem:[%s489_s0 + $0x10] sm:$0xff]  ;;  %v9_v4 = vld [vmem:[%s489_s0 + $0x8] sm:$0xff] }
   0x2   :  { %v25_v2 = vand.u32 127, %v24_v0  ;;  %v11_v5 = vld [vmem:[%s489_s0 + $0x18] sm:$0xff]  ;;  %v12_v10 = vld [vmem:[%s489_s0 + $0x20] sm:$0xff]  ;;  %v13_v11 = vld [vmem:[%s489_s0 + $0x28] sm:$0xff] }
   0x3   :  { %v14_v14 = vld [vmem:[%s489_s0 + $0x30] sm:$0xff]  ;;  %v15_v15 = vld [vmem:[%s489_s0 + $0x38] sm:$0xff]  ;;  %v16_v18 = vld [vmem:[%s489_s0 + $0x40] sm:$0xff] }
   0x4   :  { %vm26_vm0 = vcmp.lt.s32.totalorder %v25_v2, 10  ;;  %v17_v19 = vld [vmem:[%s489_s0 + $0x48] sm:$0xff]  ;;  %v18_v22 = vld [vmem:[%s489_s0 + $0x50] sm:$0xff]  ;;  %v19_v23 = vld [vmem:[%s489_s0 + $0x58] sm:$0xff] }
   0x5   :  { %v27_v6 = vsel %vm26_vm0, %v8_v1, -1e+30  ;;  %v29_v7 = vsel %vm26_vm0, %v10_v3, -1e+30  ;;  %v28_v8 = vsel %vm26_vm0, %v9_v4, -1e+30 }
   0x6   :  { %43 = vmax.xlane.f32.xlu0 %v27_v6  ;;  %47 = vmax.xlane.f32.xlu1 %v29_v7  ;;  %v30_v9 = vsel %vm26_vm0, %v11_v5, -1e+30  ;;  %v31_v12 = vsel %vm26_vm0, %v12_v10, -1e+30  ;;  %v32_v13 = vsel %vm26_vm0, %v13_v11, -1e+30 }
   0x7   :  { %v33_v16 = vsel %vm26_vm0, %v14_v14, -1e+30  ;;  %v34_v17 = vsel %vm26_vm0, %v15_v15, -1e+30  ;;  %v35_v20 = vsel %vm26_vm0, %v16_v18, -1e+30 }
   0x8   :  { %v36_v21 = vsel %vm26_vm0, %v17_v19, -1e+30  ;;  %v37_v24 = vsel %vm26_vm0, %v18_v22, -1e+30  ;;  %v38_v25 = vsel %vm26_vm0, %v19_v23, -1e+30 }
   0x9   :  { %v20_v26 = vld [vmem:[%s489_s0 + $0x60] sm:$0xff]  ;;  %v21_v27 = vld [vmem:[%s489_s0 + $0x68] sm:$0xff]  ;;  %v22_v30 = vld [vmem:[%s489_s0 + $0x70] sm:$0xff] }
   0xa   :  { %45 = vmax.xlane.f32.xlu0 %v28_v8  ;;  %49 = vmax.xlane.f32.xlu1 %v30_v9  ;;  %v352_v28 = vsel %vm26_vm0, %v20_v26, -1e+30  ;;  %v355_v29 = vsel %vm26_vm0, %v21_v27, -1e+30  ;;  %v23_v31 = vld [vmem:[%s489_s0 + $0x78] sm:$0xff] }
   0xb   :  { %v366_v32 = vsel %vm26_vm0, %v22_v30, -1e+30  ;;  %v369_v33 = vsel %vm26_vm0, %v23_v31, -1e+30 }
   0xe   :  { %51 = vmax.xlane.f32.xlu0 %v31_v12  ;;  %53 = vmax.xlane.f32.xlu1 %v32_v13 }
  0x12   :  { %55 = vmax.xlane.f32.xlu0 %v33_v16  ;;  %57 = vmax.xlane.f32.xlu1 %v34_v17 }
  0x16   :  { %59 = vmax.xlane.f32.xlu0 %v35_v20  ;;  %61 = vmax.xlane.f32.xlu1 %v36_v21 }
  0x1a   :  { %63 = vmax.xlane.f32.xlu0 %v37_v24  ;;  %65 = vmax.xlane.f32.xlu1 %v38_v25 }
  0x1e   :  { %67 = vmax.xlane.f32.xlu0 %v352_v28  ;;  %69 = vmax.xlane.f32.xlu1 %v355_v29 }
  0x22   :  { %71 = vmax.xlane.f32.xlu0 %v366_v32  ;;  %73 = vmax.xlane.f32.xlu1 %v369_v33 }
  0x8f   :  { %v44_v34 = vpop.xlane.xlu0 %43  ;;  %v48_v35 = vpop.xlane.xlu1 %47 }
  0x90   :  { %v373_v36 = vsub.f32 %v27_v6, %v44_v34  ;;  %v375_v37 = vsub.f32 %v29_v7, %v48_v35 }
  0x92   :  { %v91_v38 = vmul.f32 1.442695, %v373_v36  ;;  %v95_v39 = vmul.f32 1.442695, %v375_v37 }
  0x93   :  { %v46_v40 = vpop.xlane.xlu0 %45  ;;  %v50_v41 = vpop.xlane.xlu1 %49 }
  0x94   :  { %223 = vpow2.f32 %v91_v38  ;;  %v379_v42 = vsub.f32 %v28_v8, %v46_v40  ;;  %v381_v43 = vsub.f32 %v30_v9, %v50_v41 }
  0x95   :  { %225 = vpow2.f32 %v95_v39 }
  0x96   :  { %v93_v44 = vmul.f32 1.442695, %v379_v42  ;;  %v97_v45 = vmul.f32 1.442695, %v381_v43 }
  0x97   :  { %v52_v46 = vpop.xlane.xlu0 %51  ;;  %v54_v47 = vpop.xlane.xlu1 %53 }
  0x98   :  { %227 = vpow2.f32 %v93_v44  ;;  %v385_v48 = vsub.f32 %v31_v12, %v52_v46  ;;  %v387_v49 = vsub.f32 %v32_v13, %v54_v47 }
  0x99   :  { %229 = vpow2.f32 %v97_v45 }
  0x9a   :  { %v99_v50 = vmul.f32 1.442695, %v385_v48  ;;  %v101_v51 = vmul.f32 1.442695, %v387_v49 }
  0x9b   :  { %v56_v52 = vpop.xlane.xlu0 %55  ;;  %v58_v53 = vpop.xlane.xlu1 %57 }
  0x9c   :  { %231 = vpow2.f32 %v99_v50  ;;  %v391_v54 = vsub.f32 %v33_v16, %v56_v52  ;;  %v393_v55 = vsub.f32 %v34_v17, %v58_v53 }
  0x9d   :  { %233 = vpow2.f32 %v101_v51 }
  0x9e   :  { %v103_v56 = vmul.f32 1.442695, %v391_v54  ;;  %v105_v57 = vmul.f32 1.442695, %v393_v55 }
  0x9f   :  { %v60_v58 = vpop.xlane.xlu0 %59  ;;  %v62_v59 = vpop.xlane.xlu1 %61 }
  0xa0   :  { %235 = vpow2.f32 %v103_v56  ;;  %v397_v60 = vsub.f32 %v35_v20, %v60_v58  ;;  %v399_v61 = vsub.f32 %v36_v21, %v62_v59 }
  0xa1   :  { %v224_v62 = vpop.eup %223  ;;  %237 = vpow2.f32 %v105_v57 }
  0xa2   :  { %v107_v63 = vmul.f32 1.442695, %v397_v60  ;;  %123 = vadd.xlane.f32.xlu0 %v224_v62  ;;  %v109_v0 = vmul.f32 1.442695, %v399_v61  ;;  %v226_v1 = vpop.eup %225 }
  0xa3   :  { %v64_v2 = vpop.xlane.xlu0 %63  ;;  %v66_v3 = vpop.xlane.xlu1 %65 }
  0xa4   :  { %239 = vpow2.f32 %v107_v63  ;;  %v403_v4 = vsub.f32 %v37_v24, %v64_v2  ;;  %v405_v5 = vsub.f32 %v38_v25, %v66_v3 }
  0xa5   :  { %v228_v6 = vpop.eup %227  ;;  %241 = vpow2.f32 %v109_v0 }
  0xa6   :  { %v111_v7 = vmul.f32 1.442695, %v403_v4  ;;  %127 = vadd.xlane.f32.xlu0 %v226_v1  ;;  %125 = vadd.xlane.f32.xlu1 %v228_v6  ;;  %v113_v8 = vmul.f32 1.442695, %v405_v5  ;;  %v230_v9 = vpop.eup %229 }
  0xa7   :  { %v68_v10 = vpop.xlane.xlu0 %67  ;;  %v70_v11 = vpop.xlane.xlu1 %69 }
  0xa8   :  { %243 = vpow2.f32 %v111_v7  ;;  %v410_v12 = vsub.f32 %v352_v28, %v68_v10  ;;  %v413_v13 = vsub.f32 %v355_v29, %v70_v11 }
  0xa9   :  { %v232_v14 = vpop.eup %231  ;;  %245 = vpow2.f32 %v113_v8 }
  0xaa   :  { %v115_v15 = vmul.f32 1.442695, %v410_v12  ;;  %129 = vadd.xlane.f32.xlu1 %v230_v9  ;;  %131 = vadd.xlane.f32.xlu0 %v232_v14  ;;  %v117_v16 = vmul.f32 1.442695, %v413_v13  ;;  %v234_v17 = vpop.eup %233 }
  0xab   :  { %v72_v18 = vpop.xlane.xlu0 %71  ;;  %v74_v19 = vpop.xlane.xlu1 %73 }
  0xac   :  { %247 = vpow2.f32 %v115_v15  ;;  %v418_v20 = vsub.f32 %v366_v32, %v72_v18  ;;  %v421_v21 = vsub.f32 %v369_v33, %v74_v19 }
  0xad   :  { %v236_v22 = vpop.eup %235  ;;  %249 = vpow2.f32 %v117_v16 }
  0xae   :  { %v119_v23 = vmul.f32 1.442695, %v418_v20  ;;  %133 = vadd.xlane.f32.xlu1 %v234_v17  ;;  %135 = vadd.xlane.f32.xlu0 %v236_v22  ;;  %v121_v24 = vmul.f32 1.442695, %v421_v21  ;;  %v238_v25 = vpop.eup %237 }
  0xb0   :  { %251 = vpow2.f32 %v119_v23 }
  0xb1   :  { %v240_v26 = vpop.eup %239  ;;  %253 = vpow2.f32 %v121_v24 }
  0xb2   :  { %137 = vadd.xlane.f32.xlu1 %v238_v25  ;;  %139 = vadd.xlane.f32.xlu0 %v240_v26  ;;  %v242_v27 = vpop.eup %241 }
  0xb5   :  { %v244_v28 = vpop.eup %243 }
  0xb6   :  { %141 = vadd.xlane.f32.xlu1 %v242_v27  ;;  %143 = vadd.xlane.f32.xlu0 %v244_v28  ;;  %v246_v29 = vpop.eup %245 }
  0xb9   :  { %v248_v30 = vpop.eup %247 }
  0xba   :  { %145 = vadd.xlane.f32.xlu1 %v246_v29  ;;  %147 = vadd.xlane.f32.xlu0 %v248_v30  ;;  %v250_v31 = vpop.eup %249 }
  0xbd   :  { %v252_v32 = vpop.eup %251 }
  0xbe   :  { %149 = vadd.xlane.f32.xlu1 %v250_v31  ;;  %151 = vadd.xlane.f32.xlu0 %v252_v32  ;;  %v254_v33 = vpop.eup %253 }
  0xc2   :  { %153 = vadd.xlane.f32.xlu1 %v254_v33 }
 0x12b   :  { %v124_v34 = vpop.xlane.xlu0 %123 }
 0x12c   :  { %255 = vlog2.f32 %v124_v34 }
 0x12f   :  { %v126_v35 = vpop.xlane.xlu1 %125  ;;  %v128_v38 = vpop.xlane.xlu0 %127 }
 0x130   :  { %257 = vlog2.f32 %v126_v35 }
 0x131   :  { %259 = vlog2.f32 %v128_v38 }
 0x133   :  { %v130_v39 = vpop.xlane.xlu1 %129  ;;  %v132_v40 = vpop.xlane.xlu0 %131 }
 0x134   :  { %261 = vlog2.f32 %v130_v39 }
 0x135   :  { %263 = vlog2.f32 %v132_v40 }
 0x137   :  { %v134_v41 = vpop.xlane.xlu1 %133  ;;  %v136_v44 = vpop.xlane.xlu0 %135 }
 0x138   :  { %265 = vlog2.f32 %v134_v41 }
 0x139   :  { %v256_v45 = vpop.eup %255  ;;  %267 = vlog2.f32 %v136_v44 }
 0x13a   :  { %v156_v46 = vmul.f32 0.6931472, %v256_v45 }
 0x13b   :  { %v138_v47 = vpop.xlane.xlu1 %137  ;;  %v140_v50 = vpop.xlane.xlu0 %139 }
 0x13c   :  { %v187_v51 = vsub.f32 %v373_v36, %v156_v46  ;;  %269 = vlog2.f32 %v138_v47 }
 0x13d   :  { %v258_v52 = vpop.eup %257  ;;  %271 = vlog2.f32 %v140_v50 }
 0x13e   :  { %v260_v53 = vpop.eup %259  ;;  %203 = vst [vmem:[%s490_s1] sm:$0xff] %v187_v51  ;;  %v158_v56 = vmul.f32 0.6931472, %v258_v52 }
 0x13f   :  { %v160_v57 = vmul.f32 0.6931472, %v260_v53  ;;  %v142_v58 = vpop.xlane.xlu1 %141  ;;  %v144_v59 = vpop.xlane.xlu0 %143 }
 0x140   :  { %v188_v62 = vsub.f32 %v379_v42, %v158_v56  ;;  %273 = vlog2.f32 %v142_v58 }
 0x141   :  { %v262_v63 = vpop.eup %261  ;;  %v189_v0 = vsub.f32 %v375_v37, %v160_v57  ;;  %275 = vlog2.f32 %v144_v59 }
 0x142   :  { %v264_v36 = vpop.eup %263  ;;  %204 = vst [vmem:[%s490_s1 + $0x8] sm:$0xff] %v188_v62  ;;  %v162_v1 = vmul.f32 0.6931472, %v262_v63 }
 0x143   :  { %205 = vst [vmem:[%s490_s1 + $0x10] sm:$0xff] %v189_v0  ;;  %v164_v2 = vmul.f32 0.6931472, %v264_v36  ;;  %v146_v3 = vpop.xlane.xlu1 %145  ;;  %v148_v6 = vpop.xlane.xlu0 %147 }
 0x144   :  { %v190_v42 = vsub.f32 %v381_v43, %v162_v1  ;;  %277 = vlog2.f32 %v146_v3 }
 0x145   :  { %v266_v7 = vpop.eup %265  ;;  %v191_v37 = vsub.f32 %v385_v48, %v164_v2  ;;  %279 = vlog2.f32 %v148_v6 }
 0x146   :  { %v268_v8 = vpop.eup %267  ;;  %206 = vst [vmem:[%s490_s1 + $0x18] sm:$0xff] %v190_v42  ;;  %v166_v9 = vmul.f32 0.6931472, %v266_v7 }
 0x147   :  { %207 = vst [vmem:[%s490_s1 + $0x20] sm:$0xff] %v191_v37  ;;  %v168_v10 = vmul.f32 0.6931472, %v268_v8  ;;  %v150_v11 = vpop.xlane.xlu1 %149  ;;  %v152_v14 = vpop.xlane.xlu0 %151 }
 0x148   :  { %v192_v43 = vsub.f32 %v387_v49, %v166_v9  ;;  %281 = vlog2.f32 %v150_v11 }
 0x149   :  { %v270_v15 = vpop.eup %269  ;;  %v193_v48 = vsub.f32 %v391_v54, %v168_v10  ;;  %283 = vlog2.f32 %v152_v14 }
 0x14a   :  { %v272_v16 = vpop.eup %271  ;;  %208 = vst [vmem:[%s490_s1 + $0x28] sm:$0xff] %v192_v43  ;;  %v170_v17 = vmul.f32 0.6931472, %v270_v15 }
 0x14b   :  { %209 = vst [vmem:[%s490_s1 + $0x30] sm:$0xff] %v193_v48  ;;  %v172_v18 = vmul.f32 0.6931472, %v272_v16  ;;  %v154_v19 = vpop.xlane.xlu1 %153 }
 0x14c   :  { %v194_v22 = vsub.f32 %v393_v55, %v170_v17  ;;  %285 = vlog2.f32 %v154_v19 }
 0x14d   :  { %v274_v49 = vpop.eup %273  ;;  %v195_v23 = vsub.f32 %v397_v60, %v172_v18 }
 0x14e   :  { %v276_v54 = vpop.eup %275  ;;  %210 = vst [vmem:[%s490_s1 + $0x38] sm:$0xff] %v194_v22  ;;  %v174_v24 = vmul.f32 0.6931472, %v274_v49 }
 0x14f   :  { %211 = vst [vmem:[%s490_s1 + $0x40] sm:$0xff] %v195_v23  ;;  %v176_v25 = vmul.f32 0.6931472, %v276_v54 }
 0x150   :  { %v196_v26 = vsub.f32 %v399_v61, %v174_v24 }
 0x151   :  { %v278_v27 = vpop.eup %277  ;;  %v197_v55 = vsub.f32 %v403_v4, %v176_v25 }
 0x152   :  { %v280_v28 = vpop.eup %279  ;;  %212 = vst [vmem:[%s490_s1 + $0x48] sm:$0xff] %v196_v26  ;;  %v178_v60 = vmul.f32 0.6931472, %v278_v27 }
 0x153   :  { %213 = vst [vmem:[%s490_s1 + $0x50] sm:$0xff] %v197_v55  ;;  %v180_v29 = vmul.f32 0.6931472, %v280_v28 }
 0x154   :  { %v198_v30 = vsub.f32 %v405_v5, %v178_v60 }
 0x155   :  { %v282_v31 = vpop.eup %281  ;;  %v199_v32 = vsub.f32 %v410_v12, %v180_v29 }
 0x156   :  { %v284_v61 = vpop.eup %283  ;;  %214 = vst [vmem:[%s490_s1 + $0x58] sm:$0xff] %v198_v30  ;;  %v182_v4 = vmul.f32 0.6931472, %v282_v31 }
 0x157   :  { %215 = vst [vmem:[%s490_s1 + $0x60] sm:$0xff] %v199_v32  ;;  %v184_v33 = vmul.f32 0.6931472, %v284_v61 }
 0x158   :  { %v200_v34 = vsub.f32 %v413_v13, %v182_v4 }
 0x159   :  { %v286_v35 = vpop.eup %285  ;;  %v201_v38 = vsub.f32 %v418_v20, %v184_v33 }
 0x15a   :  { %216 = vst [vmem:[%s490_s1 + $0x68] sm:$0xff] %v200_v34  ;;  %v186_v5 = vmul.f32 0.6931472, %v286_v35 }
 0x15b   :  { %217 = vst [vmem:[%s490_s1 + $0x70] sm:$0xff] %v201_v38 }
 0x15c   :  { %v202_v12 = vsub.f32 %v421_v21, %v186_v5 }
 0x15e   :  { %218 = vst [vmem:[%s490_s1 + $0x78] sm:$0xff] %v202_v12 }

// kernel: hgnn_forward.12
= control target key start
LH: loop header
LB: loop body
LE: loop exit
PB: predicated region body
PF: predicated region fallthrough
CT: control target
= control target key end

     0   :  { %s487_s1 = inlined_call_operand.vmem [shape: f32[128,128], index: 1, kind: input, shape index: {}]   ;;  %s488_s0 = inlined_call_operand.vmem [shape: f32[128,128], index: 0, kind: input, shape index: {}]   ;;  %s489_s2 = inlined_call_operand.vmem [shape: f32[128,128], index: 2, kind: output, shape index: {}]  }
   0x1   :  { %v42_v0 = vld [vmem:[%s487_s1 + $0x78] sm:$0xff]  ;;  %v41_v1 = vld [vmem:[%s487_s1 + $0x70] sm:$0xff]  ;;  %v40_v2 = vld [vmem:[%s487_s1 + $0x68] sm:$0xff] }
   0x2   :  { %240 = vmatprep.subr.mxu0 %v42_v0  ;;  %296 = vmatprep.subr.mxu1 %v42_v0  ;;  %v39_v3 = vld [vmem:[%s487_s1 + $0x60] sm:$0xff]  ;;  %v38_v4 = vld [vmem:[%s487_s1 + $0x58] sm:$0xff]  ;;  %v37_v5 = vld [vmem:[%s487_s1 + $0x50] sm:$0xff] }
   0x3   :  { %241 = vmatpush3.msra.mxu0 %v42_v0  ;;  %312 = vmatpush3.msra.mxu1 %v42_v0  ;;  %v36_v6 = vld [vmem:[%s487_s1 + $0x48] sm:$0xff]  ;;  %v35_v7 = vld [vmem:[%s487_s1 + $0x40] sm:$0xff]  ;;  %v34_v8 = vld [vmem:[%s487_s1 + $0x38] sm:$0xff] }
   0x4   :  { %242 = vmatprep.subr.mxu0 %v41_v1  ;;  %297 = vmatprep.subr.mxu1 %v41_v1  ;;  %v33_v9 = vld [vmem:[%s487_s1 + $0x30] sm:$0xff]  ;;  %v32_v10 = vld [vmem:[%s487_s1 + $0x28] sm:$0xff]  ;;  %v31_v11 = vld [vmem:[%s487_s1 + $0x20] sm:$0xff] }
   0x5   :  { %243 = vmatpush3.msra.mxu0 %v41_v1  ;;  %313 = vmatpush3.msra.mxu1 %v41_v1  ;;  %v30_v12 = vld [vmem:[%s487_s1 + $0x18] sm:$0xff]  ;;  %v29_v13 = vld [vmem:[%s487_s1 + $0x10] sm:$0xff]  ;;  %v28_v14 = vld [vmem:[%s487_s1 + $0x8] sm:$0xff] }
   0x6   :  { %244 = vmatprep.subr.mxu0 %v40_v2  ;;  %298 = vmatprep.subr.mxu1 %v40_v2  ;;  %v27_v15 = vld [vmem:[%s487_s1] sm:$0xff]  ;;  %v12_v18 = vld [vmem:[%s488_s0 + $0x8] sm:$0xff]  ;;  %v13_v20 = vld [vmem:[%s488_s0 + $0x10] sm:$0xff] }
   0x7   :  { %245 = vmatpush3.msra.mxu0 %v40_v2  ;;  %314 = vmatpush3.msra.mxu1 %v40_v2  ;;  %v11_v16 = vld [vmem:[%s488_s0] sm:$0xff]  ;;  %v20_v19 = vld [vmem:[%s488_s0 + $0x48] sm:$0xff]  ;;  %v21_v21 = vld [vmem:[%s488_s0 + $0x50] sm:$0xff] }
   0x8   :  { %246 = vmatprep.subr.mxu0 %v39_v3  ;;  %299 = vmatprep.subr.mxu1 %v39_v3  ;;  %v19_v17 = vld [vmem:[%s488_s0 + $0x40] sm:$0xff]  ;;  %v14_v22 = vld [vmem:[%s488_s0 + $0x18] sm:$0xff]  ;;  %v16_v26 = vld [vmem:[%s488_s0 + $0x28] sm:$0xff] }
   0x9   :  { %247 = vmatpush3.msra.mxu0 %v39_v3  ;;  %315 = vmatpush3.msra.mxu1 %v39_v3  ;;  %v22_v23 = vld [vmem:[%s488_s0 + $0x58] sm:$0xff]  ;;  %v15_v24 = vld [vmem:[%s488_s0 + $0x20] sm:$0xff]  ;;  %v24_v27 = vld [vmem:[%s488_s0 + $0x68] sm:$0xff] }
   0xa   :  { %248 = vmatprep.subr.mxu0 %v38_v4  ;;  %300 = vmatprep.subr.mxu1 %v38_v4  ;;  %v23_v25 = vld [vmem:[%s488_s0 + $0x60] sm:$0xff]  ;;  %v17_v28 = vld [vmem:[%s488_s0 + $0x30] sm:$0xff]  ;;  %v18_v30 = vld [vmem:[%s488_s0 + $0x38] sm:$0xff] }
   0xb   :  { %249 = vmatpush3.msra.mxu0 %v38_v4  ;;  %316 = vmatpush3.msra.mxu1 %v38_v4  ;;  %v25_v29 = vld [vmem:[%s488_s0 + $0x70] sm:$0xff]  ;;  %v26_v31 = vld [vmem:[%s488_s0 + $0x78] sm:$0xff] }
   0xc   :  { %250 = vmatprep.subr.mxu0 %v37_v5  ;;  %301 = vmatprep.subr.mxu1 %v37_v5 }
   0xd   :  { %251 = vmatpush3.msra.mxu0 %v37_v5  ;;  %317 = vmatpush3.msra.mxu1 %v37_v5 }
   0xe   :  { %252 = vmatprep.subr.mxu0 %v36_v6  ;;  %302 = vmatprep.subr.mxu1 %v36_v6 }
   0xf   :  { %253 = vmatpush3.msra.mxu0 %v36_v6  ;;  %318 = vmatpush3.msra.mxu1 %v36_v6 }
  0x10   :  { %254 = vmatprep.subr.mxu0 %v35_v7  ;;  %303 = vmatprep.subr.mxu1 %v35_v7 }
  0x11   :  { %255 = vmatpush3.msra.mxu0 %v35_v7  ;;  %319 = vmatpush3.msra.mxu1 %v35_v7 }
  0x12   :  { %256 = vmatprep.subr.mxu0 %v34_v8  ;;  %304 = vmatprep.subr.mxu1 %v34_v8 }
  0x13   :  { %257 = vmatpush3.msra.mxu0 %v34_v8  ;;  %320 = vmatpush3.msra.mxu1 %v34_v8 }
  0x14   :  { %258 = vmatprep.subr.mxu0 %v33_v9  ;;  %305 = vmatprep.subr.mxu1 %v33_v9 }
  0x15   :  { %259 = vmatpush3.msra.mxu0 %v33_v9  ;;  %321 = vmatpush3.msra.mxu1 %v33_v9 }
  0x16   :  { %260 = vmatprep.subr.mxu0 %v32_v10  ;;  %306 = vmatprep.subr.mxu1 %v32_v10 }
  0x17   :  { %261 = vmatpush3.msra.mxu0 %v32_v10  ;;  %322 = vmatpush3.msra.mxu1 %v32_v10 }
  0x18   :  { %262 = vmatprep.subr.mxu0 %v31_v11  ;;  %307 = vmatprep.subr.mxu1 %v31_v11 }
  0x19   :  { %263 = vmatpush3.msra.mxu0 %v31_v11  ;;  %323 = vmatpush3.msra.mxu1 %v31_v11 }
  0x1a   :  { %264 = vmatprep.subr.mxu0 %v30_v12  ;;  %308 = vmatprep.subr.mxu1 %v30_v12 }
  0x1b   :  { %265 = vmatpush3.msra.mxu0 %v30_v12  ;;  %324 = vmatpush3.msra.mxu1 %v30_v12 }
  0x1c   :  { %266 = vmatprep.subr.mxu0 %v29_v13  ;;  %309 = vmatprep.subr.mxu1 %v29_v13 }
  0x1d   :  { %267 = vmatpush3.msra.mxu0 %v29_v13  ;;  %325 = vmatpush3.msra.mxu1 %v29_v13 }
  0x1e   :  { %268 = vmatprep.subr.mxu0 %v28_v14  ;;  %310 = vmatprep.subr.mxu1 %v28_v14 }
  0x1f   :  { %269 = vmatpush3.msra.mxu0 %v28_v14  ;;  %326 = vmatpush3.msra.mxu1 %v28_v14 }
  0x20   :  { %270 = vmatprep.subr.mxu0 %v27_v15  ;;  %311 = vmatprep.subr.mxu1 %v27_v15 }
  0x21   :  { %271 = vmatpush3.msra.mxu0 %v27_v15  ;;  %327 = vmatpush3.msra.mxu1 %v27_v15 }
  0x22   :  { %272 = vmatprep.mubr.f32.mxu0 %v11_v16  ;;  %284 = vmatprep.mubr.f32.mxu1 %v19_v17 }
  0x23   :  { %273 = vmatmul.mubr.f32.vlgmr.msra.gmra.mxu0 %v12_v18  ;;  %285 = vmatmul.mubr.f32.vlgmr.msra.gmra.mxu1 %v20_v19 }
  0x24   :  { %275 = vmatprep.mubr.f32.mxu0 %v13_v20  ;;  %287 = vmatprep.mubr.f32.mxu1 %v21_v21 }
  0x27   :  { %276 = vmatmul.mubr.f32.gmra.mxu0 %v14_v22  ;;  %288 = vmatmul.mubr.f32.gmra.mxu1 %v22_v23 }
  0x28   :  { %278 = vmatprep.mubr.f32.mxu0 %v15_v24  ;;  %290 = vmatprep.mubr.f32.mxu1 %v23_v25 }
  0x2b   :  { %279 = vmatmul.mubr.f32.gmra.mxu0 %v16_v26  ;;  %291 = vmatmul.mubr.f32.gmra.mxu1 %v24_v27 }
  0x2c   :  { %281 = vmatprep.mubr.f32.mxu0 %v17_v28  ;;  %293 = vmatprep.mubr.f32.mxu1 %v25_v29 }
  0x2f   :  { %282 = vmatmul.mubr.f32.gmra.mxu0 %v18_v30  ;;  %294 = vmatmul.mubr.f32.gmra.mxu1 %v26_v31 }
  0xe3   :  { %v274_v32 = vpop.f32.mrf.mxu0  ;;  %v286_v33 = vpop.f32.mrf.mxu1 }
  0xe4   :  { %189 = vst [vmem:[%s489_s2 + $0x8] sm:$0xff] %v274_v32  ;;  %197 = vst [vmem:[%s489_s2 + $0x48] sm:$0xff] %v286_v33 }
  0xe5   :  { %v109_v34 = vpop.f32.mrf.mxu0  ;;  %v149_v35 = vpop.f32.mrf.mxu1 }
  0xe6   :  { %188 = vst [vmem:[%s489_s2] sm:$0xff] %v109_v34  ;;  %196 = vst [vmem:[%s489_s2 + $0x40] sm:$0xff] %v149_v35 }
  0xe7   :  { %v277_v36 = vpop.f32.mrf.mxu0  ;;  %v289_v37 = vpop.f32.mrf.mxu1 }
  0xe8   :  { %191 = vst [vmem:[%s489_s2 + $0x18] sm:$0xff] %v277_v36  ;;  %199 = vst [vmem:[%s489_s2 + $0x58] sm:$0xff] %v289_v37 }
  0xe9   :  { %v119_v38 = vpop.f32.mrf.mxu0  ;;  %v159_v39 = vpop.f32.mrf.mxu1 }
  0xea   :  { %190 = vst [vmem:[%s489_s2 + $0x10] sm:$0xff] %v119_v38  ;;  %198 = vst [vmem:[%s489_s2 + $0x50] sm:$0xff] %v159_v39 }
  0xeb   :  { %v280_v40 = vpop.f32.mrf.mxu0  ;;  %v292_v41 = vpop.f32.mrf.mxu1 }
  0xec   :  { %193 = vst [vmem:[%s489_s2 + $0x28] sm:$0xff] %v280_v40  ;;  %201 = vst [vmem:[%s489_s2 + $0x68] sm:$0xff] %v292_v41 }
  0xed   :  { %v129_v42 = vpop.f32.mrf.mxu0  ;;  %v169_v43 = vpop.f32.mrf.mxu1 }
  0xee   :  { %192 = vst [vmem:[%s489_s2 + $0x20] sm:$0xff] %v129_v42  ;;  %200 = vst [vmem:[%s489_s2 + $0x60] sm:$0xff] %v169_v43 }
  0xef   :  { %v283_v44 = vpop.f32.mrf.mxu0  ;;  %v295_v45 = vpop.f32.mrf.mxu1 }
  0xf0   :  { %195 = vst [vmem:[%s489_s2 + $0x38] sm:$0xff] %v283_v44  ;;  %203 = vst [vmem:[%s489_s2 + $0x78] sm:$0xff] %v295_v45 }
  0xf1   :  { %v139_v46 = vpop.f32.mrf.mxu0  ;;  %v179_v47 = vpop.f32.mrf.mxu1 }
  0xf2   :  { %194 = vst [vmem:[%s489_s2 + $0x30] sm:$0xff] %v139_v46  ;;  %202 = vst [vmem:[%s489_s2 + $0x70] sm:$0xff] %v179_v47 }

</bundles_post_ra>
